<compile_context>
chip_gen: v7x
topology: tpu7x:2x2x1
jax: 0.10.0
libtpu: 0.0.40
codegen_flags: <defaults>
</compile_context>

<pallas_src>
import math

import jax
import jax.numpy as jnp
from jax.experimental import pallas as pl
from jax.experimental.pallas import tpu as pltpu

_LANES = 128
_CHUNK_ROWS = 256                      # in-kernel accumulation chunk (rows)
_TARGET_STEP_BYTES = 8 * 1024 * 1024   # combined input bytes per grid step
_VMEM_LIMIT_BYTES = 32 * 1024 * 1024   # headroom for double-buffered blocks


def _pick_blocking(rows, bytes_per_elem_pair):
    """Choose (block_rows, chunk_rows) for a (rows, 128) problem."""
    if rows <= _CHUNK_ROWS:
        # Tiny problem: one block equal to the full array (block == array dims
        # is always a legal BlockSpec, regardless of 8-row alignment).
        return rows, rows
    per_row_bytes = _LANES * bytes_per_elem_pair
    target = (_TARGET_STEP_BYTES // per_row_bytes) // _CHUNK_ROWS * _CHUNK_ROWS
    target = max(_CHUNK_ROWS, target)
    # Keep at least 2 grid blocks so the "parallel" axis can shard across the
    # two TensorCores on v7x instead of collapsing to a single block.
    half = -(-rows // 2)
    half = -(-half // _CHUNK_ROWS) * _CHUNK_ROWS
    return min(target, half), _CHUNK_ROWS


def _make_dice_partials_kernel(rows_total, block_rows, chunk_rows):
    num_chunks = block_rows // chunk_rows
    # The last block is ragged only if block_rows does not divide rows_total.
    # This is a Python (trace-time) constant, so aligned sizes compile the
    # masking away entirely.
    ragged = (rows_total % block_rows) != 0

    def kernel(x_ref, t_ref, xt_out_ref, x_out_ref, t_out_ref):
        if ragged:
            # Rows at or beyond `valid` lie outside the array for the last
            # grid block and contain unspecified data -> mask them out.
            valid = rows_total - pl.program_id(0) * block_rows
        else:
            valid = None

        def accum(x_raw, t_raw, r0, s_xt, s_x, s_t):
            x = x_raw.astype(jnp.float32)
            t = t_raw.astype(jnp.float32)
            if valid is not None:
                row = r0 + jax.lax.broadcasted_iota(jnp.int32, x.shape, 0)
                keep = row < valid
                # jnp.where (not multiply-by-0) so NaN/Inf garbage in the
                # unspecified out-of-bounds rows cannot leak into the sums.
                x = jnp.where(keep, x, 0.0)
                t = jnp.where(keep, t, 0.0)
            s_xt = s_xt + jnp.sum(x * t, axis=0, keepdims=True)
            s_x = s_x + jnp.sum(x, axis=0, keepdims=True)
            s_t = s_t + jnp.sum(t, axis=0, keepdims=True)
            return s_xt, s_x, s_t

        zero = jnp.zeros((1, _LANES), jnp.float32)
        if num_chunks == 1:
            s_xt, s_x, s_t = accum(x_ref[...], t_ref[...], 0, zero, zero, zero)
        else:
            def body(c, carry):
                r0 = pl.multiple_of(c * chunk_rows, chunk_rows)
                x_raw = x_ref[pl.ds(r0, chunk_rows), :]
                t_raw = t_ref[pl.ds(r0, chunk_rows), :]
                return accum(x_raw, t_raw, r0, *carry)

            s_xt, s_x, s_t = jax.lax.fori_loop(
                0, num_chunks, body, (zero, zero, zero))

        # Three direct full-block stores -- no concatenate/relayout per step.
        xt_out_ref[...] = s_xt.reshape(1, 1, _LANES)
        x_out_ref[...] = s_x.reshape(1, 1, _LANES)
        t_out_ref[...] = s_t.reshape(1, 1, _LANES)

    return kernel


def dice_loss(inputs, targets, smooth=1.0):
    """Pallas DiceLoss forward. inputs/targets: same shape, any real dtype."""
    assert inputs.shape == targets.shape
    total = math.prod(inputs.shape)

    x = inputs.reshape(-1)
    t = targets.reshape(-1)

    rem = total % _LANES
    if rem:
        # Ragged lane count: a (rows, 128) view is impossible, so pad the flat
        # vector up to the next lane multiple (<128 zeros, exact for all three
        # sums). Typical shapes are 128-aligned and take the copy-free path.
        x = jnp.pad(x, (0, _LANES - rem))
        t = jnp.pad(t, (0, _LANES - rem))
    rows = -(-total // _LANES)

    x2 = x.reshape(rows, _LANES)
    t2 = t.reshape(rows, _LANES)

    block_rows, chunk_rows = _pick_blocking(
        rows, x2.dtype.itemsize + t2.dtype.itemsize)
    num_blocks = -(-rows // block_rows)

    part_shape = jax.ShapeDtypeStruct((num_blocks, 1, _LANES), jnp.float32)
    part_spec = pl.BlockSpec((1, 1, _LANES), lambda i: (i, 0, 0))
    in_spec = pl.BlockSpec((block_rows, _LANES), lambda i: (i, 0))

    s_xt, s_x, s_t = pl.pallas_call(
        _make_dice_partials_kernel(rows, block_rows, chunk_rows),
        out_shape=(part_shape, part_shape, part_shape),
        grid=(num_blocks,),
        in_specs=[in_spec, in_spec],
        out_specs=(part_spec, part_spec, part_spec),
        compiler_params=pltpu.CompilerParams(
            dimension_semantics=("parallel",),
            vmem_limit_bytes=_VMEM_LIMIT_BYTES,
        ),
    )(x2, t2)

    intersection = jnp.sum(s_xt)
    sum_x = jnp.sum(s_x)
    sum_t = jnp.sum(s_t)
    smooth = jnp.float32(smooth)
    dice = (2.0 * intersection + smooth) / (sum_x + sum_t + smooth)
    return 1.0 - dice


def dice_loss_ref(inputs, targets, smooth=1.0):
    """Pure-JAX reference mirroring the PyTorch forward."""
    x = inputs.reshape(-1).astype(jnp.float32)
    t = targets.reshape(-1).astype(jnp.float32)
    intersection = jnp.sum(x * t)
    dice = (2.0 * intersection + smooth) / (jnp.sum(x) + jnp.sum(t) + smooth)
    return 1.0 - dice


if __name__ == "__main__":
    key = jax.random.PRNGKey(0)
    k1, k2, k3, k4, k5, k6 = jax.random.split(key, 6)

    # Test 1: f32 probability map vs binary f32 mask. total % 128 == 0 ->
    # copy-free view, single block, single chunk, no masking.
    shape1 = (2, 4, 16, 16)
    x1 = jax.nn.sigmoid(jax.random.normal(k1, shape1, dtype=jnp.float32))
    t1 = (jax.random.uniform(k2, shape1) > 0.5).astype(jnp.float32)
    out1 = jax.block_until_ready(dice_loss(x1, t1))
    ref1 = dice_loss_ref(x1, t1)
    assert jnp.allclose(out1, ref1, rtol=1e-5, atol=1e-5), (out1, ref1)

    # Test 2: bf16 inputs (in-kernel upcast) with a ragged element count ->
    # exercises the minimal lane-pad fallback path.
    shape2 = (3, 5, 17, 13)
    x2 = jax.random.uniform(k3, shape2, dtype=jnp.float32).astype(jnp.bfloat16)
    t2 = (jax.random.uniform(k4, shape2) > 0.5).astype(jnp.bfloat16)
    out2 = jax.block_until_ready(dice_loss(x2, t2, smooth=1.0))
    ref2 = dice_loss_ref(x2, t2, smooth=1.0)
    assert jnp.allclose(out2, ref2, rtol=1e-4, atol=1e-4), (out2, ref2)

    # Test 3: f32 probabilities vs int8 mask (narrow target dtype consumed
    # natively), multi-block "parallel" grid with a ragged last block and the
    # chunked fori_loop accumulation path; run under jit.
    shape3 = (2, 4, 96, 96)
    x3 = jax.nn.sigmoid(jax.random.normal(k5, shape3, dtype=jnp.float32))
    t3 = (jax.random.uniform(k6, shape3) > 0.5).astype(jnp.int8)
    out3 = jax.block_until_ready(jax.jit(dice_loss)(x3, t3))
    ref3 = dice_loss_ref(x3, t3)
    assert jnp.allclose(out3, ref3, rtol=1e-4, atol=1e-4), (out3, ref3)

    print("KERNEL_OK")
</pallas_src>

<mosaic_0001>
module attributes {stable_mosaic.version = 11 : i64} {
  func.func @kernel(%arg0: i32, %arg1: memref<16x128xf32, #tpu.memory_space<vmem>>, %arg2: memref<16x128xf32, #tpu.memory_space<vmem>>, %arg3: memref<1x1x128xf32, #tpu.memory_space<vmem>>, %arg4: memref<1x1x128xf32, #tpu.memory_space<vmem>>, %arg5: memref<1x1x128xf32, #tpu.memory_space<vmem>>) attributes {dimension_semantics = [#tpu.dimension_semantics<parallel>], iteration_bounds = array<i64: 1>, scalar_prefetch = 0 : i64, scratch_operands = 0 : i64, tpu.core_type = #tpu.core_type<tc>, window_params = [{transform_indices = @transform_0, window_bounds = array<i64: 16, 128>}, {transform_indices = @transform_1, window_bounds = array<i64: 16, 128>}, {transform_indices = @transform_2, window_bounds = array<i64: 1, 1, 128>}, {transform_indices = @transform_3, window_bounds = array<i64: 1, 1, 128>}, {transform_indices = @transform_4, window_bounds = array<i64: 1, 1, 128>}]} {
    %cst = arith.constant 0.000000e+00 : f32
    %0 = vector.broadcast %cst : f32 to vector<1x128xf32>
    %c0 = arith.constant 0 : index
    %c0_0 = arith.constant 0 : index
    %1 = vector.load %arg1[%c0, %c0_0] : memref<16x128xf32, #tpu.memory_space<vmem>>, vector<16x128xf32>
    %c0_1 = arith.constant 0 : index
    %c0_2 = arith.constant 0 : index
    %2 = vector.load %arg2[%c0_1, %c0_2] : memref<16x128xf32, #tpu.memory_space<vmem>>, vector<16x128xf32>
    %3 = arith.mulf %1, %2 : vector<16x128xf32>
    %cst_3 = arith.constant dense<0.000000e+00> : vector<128xf32>
    %4 = vector.multi_reduction <add>, %3, %cst_3 [0] : vector<16x128xf32> to vector<128xf32>
    %5 = vector.shape_cast %4 : vector<128xf32> to vector<1x128xf32>
    %6 = arith.addf %0, %5 : vector<1x128xf32>
    %cst_4 = arith.constant dense<0.000000e+00> : vector<128xf32>
    %7 = vector.multi_reduction <add>, %1, %cst_4 [0] : vector<16x128xf32> to vector<128xf32>
    %8 = vector.shape_cast %7 : vector<128xf32> to vector<1x128xf32>
    %9 = arith.addf %0, %8 : vector<1x128xf32>
    %cst_5 = arith.constant dense<0.000000e+00> : vector<128xf32>
    %10 = vector.multi_reduction <add>, %2, %cst_5 [0] : vector<16x128xf32> to vector<128xf32>
    %11 = vector.shape_cast %10 : vector<128xf32> to vector<1x128xf32>
    %12 = arith.addf %0, %11 : vector<1x128xf32>
    %13 = vector.shape_cast %6 : vector<1x128xf32> to vector<1x1x128xf32>
    %c0_6 = arith.constant 0 : index
    %c0_7 = arith.constant 0 : index
    %c0_8 = arith.constant 0 : index
    %14 = vector.load %arg3[%c0_6, %c0_7, %c0_8] : memref<1x1x128xf32, #tpu.memory_space<vmem>>, vector<1x1x128xf32>
    tpu.vector_store %arg3[%c0_6, %c0_7, %c0_8], %13 {strides = array<i32>} : memref<1x1x128xf32, #tpu.memory_space<vmem>>, vector<1x1x128xf32>,
    %15 = vector.shape_cast %9 : vector<1x128xf32> to vector<1x1x128xf32>
    %c0_9 = arith.constant 0 : index
    %c0_10 = arith.constant 0 : index
    %c0_11 = arith.constant 0 : index
    %16 = vector.load %arg4[%c0_9, %c0_10, %c0_11] : memref<1x1x128xf32, #tpu.memory_space<vmem>>, vector<1x1x128xf32>
    tpu.vector_store %arg4[%c0_9, %c0_10, %c0_11], %15 {strides = array<i32>} : memref<1x1x128xf32, #tpu.memory_space<vmem>>, vector<1x1x128xf32>,
    %17 = vector.shape_cast %12 : vector<1x128xf32> to vector<1x1x128xf32>
    %c0_12 = arith.constant 0 : index
    %c0_13 = arith.constant 0 : index
    %c0_14 = arith.constant 0 : index
    %18 = vector.load %arg5[%c0_12, %c0_13, %c0_14] : memref<1x1x128xf32, #tpu.memory_space<vmem>>, vector<1x1x128xf32>
    tpu.vector_store %arg5[%c0_12, %c0_13, %c0_14], %17 {strides = array<i32>} : memref<1x1x128xf32, #tpu.memory_space<vmem>>, vector<1x1x128xf32>,
    return
  }
  func.func @transform_0(%arg0: i32) -> (i32, i32) {
    %c0_i32 = arith.constant 0 : i32
    %c0_i32_0 = arith.constant 0 : i32
    return %arg0, %c0_i32 : i32, i32
  }
  func.func @transform_1(%arg0: i32) -> (i32, i32) {
    %c0_i32 = arith.constant 0 : i32
    %c0_i32_0 = arith.constant 0 : i32
    return %arg0, %c0_i32 : i32, i32
  }
  func.func @transform_2(%arg0: i32) -> (i32, i32, i32) {
    %c0_i32 = arith.constant 0 : i32
    %c0_i32_0 = arith.constant 0 : i32
    %c0_i32_1 = arith.constant 0 : i32
    return %arg0, %c0_i32, %c0_i32_0 : i32, i32, i32
  }
  func.func @transform_3(%arg0: i32) -> (i32, i32, i32) {
    %c0_i32 = arith.constant 0 : i32
    %c0_i32_0 = arith.constant 0 : i32
    %c0_i32_1 = arith.constant 0 : i32
    return %arg0, %c0_i32, %c0_i32_0 : i32, i32, i32
  }
  func.func @transform_4(%arg0: i32) -> (i32, i32, i32) {
    %c0_i32 = arith.constant 0 : i32
    %c0_i32_0 = arith.constant 0 : i32
    %c0_i32_1 = arith.constant 0 : i32
    return %arg0, %c0_i32, %c0_i32_0 : i32, i32, i32
  }
}

</mosaic_0001>

<bundles_post_ra>
// kernel: tpu_custom_call.1
= control target key start
LH: loop header
LB: loop body
LE: loop exit
PB: predicated region body
PF: predicated region fallthrough
CT: control target
= control target key end

     0   :  { %10 = vsyncpa [#allocation3], 0  ;;  %s353_s0 = inlined_call_operand.hbm [shape: f32[16,128], index: 0, kind: input, shape index: {}]   ;;  %s354_s1 = inlined_call_operand.hbm [shape: f32[16,128], index: 1, kind: input, shape index: {}]   ;;  %s355_s2 = inlined_call_operand.hbm [shape: f32[1,1,128], index: 2, kind: output, shape index: {0}]   ;;  %s356_s3 = inlined_call_operand.hbm [shape: f32[1,1,128], index: 3, kind: output, shape index: {1}]   ;;  %s357_s4 = inlined_call_operand.hbm [shape: f32[1,1,128], index: 4, kind: output, shape index: {2}]  }
   0x1   :  { %11 = vsyncpa [#allocation6], 0 }
   0x2   :  { %12 = vsyncpa [#allocation4], 0 }
   0x3   :  { %13 = vsyncpa [#allocation9], 0  ;;  %s245_s15 = smov [#allocation2]   ;;  %s127_s19 = scalar_lea.hbm %s353_s0, 256 }
   0x4   :  { %s19_s16 = sshll.u32 %s245_s15, 4  ;;  %p128_p0 = scmp.ne.s32.totalorder %s353_s0, %s127_s19  ;;  %s20_s16 = int_to_ptr.vmem [resolvable:$true] %s19_s16 }
   0x5   :  { %p131_p1 = scmp.lt.u32.totalorder %s127_s19, %s353_s0 }
   0x7   :  { %p133_p2 = pnand %p131_p1, %p128_p0 }
   0x9   :  { %136 = shalt.err (!%p133_p2)
}
   0xa   :  { %s137_s24 = scalar_lea.vmem %s20_s16, 256  ;;  %p142_p4 = scmp.lt.s32.totalorder %s20_s16, %s20_s16 }
   0xb   :  { %p138_p3 = scmp.ne.s32.totalorder %s20_s16, %s137_s24  ;;  %p143_p5 = scmp.lt.s32.totalorder %s137_s24, %s137_s24 }
   0xd   :  { %p144_p6 = por %p143_p5, %p142_p4 }
   0xf   :  { %p145_p7 = pnand %p144_p6, %p138_p3 }
  0x11   :  { %148 = shalt.err (!%p145_p7)
}
  0x12   :  { %s246_s25 = smov 128   ;;  %s247_s26 = smov 8  }
  0x13   :  { %25 = dma.hbm_to_vmem [thread:$0]  %s353_s0, 256, %s20_s16, [#allocation3], %s246_s25, %s246_s25, %s247_s26  }
  0x14   :  { %s248_s29 = smov [#allocation5]   ;;  %s149_s7 = scalar_lea.hbm %s354_s1, 256 }
  0x15   :  { %s31_s30 = sshll.u32 %s248_s29, 4  ;;  %p150_p8 = scmp.ne.s32.totalorder %s354_s1, %s149_s7  ;;  %s32_s30 = int_to_ptr.vmem [resolvable:$true] %s31_s30 }
  0x16   :  { %p153_p9 = scmp.lt.u32.totalorder %s149_s7, %s354_s1 }
  0x18   :  { %p155_p10 = pnand %p153_p9, %p150_p8 }
  0x1a   :  { %158 = shalt.err (!%p155_p10)
}
  0x1b   :  { %s159_s12 = scalar_lea.vmem %s32_s30, 256  ;;  %p164_p12 = scmp.lt.s32.totalorder %s32_s30, %s32_s30 }
  0x1c   :  { %p160_p11 = scmp.ne.s32.totalorder %s32_s30, %s159_s12  ;;  %p165_p13 = scmp.lt.s32.totalorder %s159_s12, %s159_s12 }
  0x1e   :  { %p166_p0 = por %p165_p13, %p164_p12 }
  0x20   :  { %p167_p1 = pnand %p166_p0, %p160_p11 }
  0x22   :  { %170 = shalt.err (!%p167_p1)
}
  0x23   :  { %37 = dma.hbm_to_vmem [thread:$0]  %s354_s1, 256, %s32_s30, [#allocation6], %s246_s25, %s246_s25, %s247_s26  }
  0x24   :  { %237 = dma.done.wait [#allocation3], 256  }
  0x25   :  { %238 = vsyncadd [#allocation3], 4294967040 }
  0x26   :  { %239 = dma.done.wait [#allocation6], 256  }
  0x27   :  { %240 = vsyncadd [#allocation6], 4294967040  ;;  %v44_v0 = vld [vmem:[#allocation2] sm:$0xff]  ;;  %v45_v1 = vld [vmem:[#allocation2 + $0x8] sm:$0xff]  ;;  %s249_s1 = smov [#allocation8]   ;;  %s250_s15 = smov [#allocation10]  }
  0x28   :  { %v46_v2 = vld [vmem:[#allocation5] sm:$0xff]  ;;  %v58_v3 = vadd.f32 %v45_v1, %v44_v0  ;;  %v47_v4 = vld [vmem:[#allocation5 + $0x8] sm:$0xff]  ;;  %s93_s14 = sshll.u32 %s249_s1, 4  ;;  %s103_s16 = sshll.u32 %s250_s15, 4  ;;  %s94_s14 = int_to_ptr.vmem [resolvable:$true] %s93_s14  ;;  %s301_s16 = int_to_ptr.vmem [resolvable:$true] %s103_s16 }
  0x29   :  { %v48_v5 = vmul.f32 %v46_v2, %v44_v0  ;;  %v49_v6 = vmul.f32 %v47_v4, %v45_v1  ;;  %v66_v7 = vadd.f32 %v47_v4, %v46_v2  ;;  %s251_s17 = smov [#allocation7]   ;;  %s171_s19 = scalar_lea.vmem %s94_s14, 16 }
  0x2a   :  { %v59_v8 = vrot.slane %v58_v3, 4  ;;  %s83_s18 = sshll.u32 %s251_s17, 4  ;;  %p172_p2 = scmp.ne.s32.totalorder %s94_s14, %s171_s19  ;;  %s303_s18 = int_to_ptr.vmem [resolvable:$true] %s83_s18 }
  0x2b   :  { %v50_v9 = vadd.f32 %v49_v6, %v48_v5  ;;  %v67_v10 = vrot.slane %v66_v7, 4  ;;  %s175_s20 = scalar_lea.vmem %s94_s14, 32  ;;  %p176_p3 = scmp.lt.s32.totalorder %s94_s14, %s94_s14 }
  0x2c   :  { %v60_v11 = vadd.f32 %v59_v8, %v58_v3  ;;  %p177_p4 = scmp.lt.s32.totalorder %s175_s20, %s171_s19 }
  0x2d   :  { %v51_v12 = vrot.slane %v50_v9, 4  ;;  %v68_v13 = vadd.f32 %v67_v10, %v66_v7 }
  0x2e   :  { %v61_v14 = vrot.slane %v60_v11, 2  ;;  %p178_p5 = por %p177_p4, %p176_p3 }
  0x2f   :  { %v52_v15 = vadd.f32 %v51_v12, %v50_v9  ;;  %v69_v16 = vrot.slane %v68_v13, 2 }
  0x30   :  { %v62_v17 = vadd.f32 %v61_v14, %v60_v11  ;;  %p179_p6 = pnand %p178_p5, %p172_p2 }
  0x31   :  { %v53_v18 = vrot.slane %v52_v15, 2  ;;  %v70_v19 = vadd.f32 %v69_v16, %v68_v13 }
  0x32   :  { %v63_v20 = vrot.slane %v62_v17, 1 }
  0x33   :  { %v54_v21 = vadd.f32 %v53_v18, %v52_v15  ;;  %v71_v22 = vrot.slane %v70_v19, 1 }
  0x34   :  { %v64_v23 = vadd.f32 %v63_v20, %v62_v17 }
  0x35   :  { %v55_v24 = vrot.slane %v54_v21, 1  ;;  %v72_v25 = vadd.f32 %v71_v22, %v70_v19 }
  0x36   :  { %75 = vst [vmem:[#allocation8] sm:$0x1] %v64_v23 }
  0x37   :  { %v56_v26 = vadd.f32 %v55_v24, %v54_v21  ;;  %76 = vst [vmem:[#allocation10] sm:$0x1] %v72_v25 }
  0x38   :  { %182 = shalt.err (!%p179_p6)
}
  0x39   :  { %s183_s23 = scalar_lea.hbm %s356_s3, 16 }
  0x3a   :  { %p184_p7 = scmp.ne.s32.totalorder %s356_s3, %s183_s23  ;;  %p187_p8 = scmp.lt.u32.totalorder %s183_s23, %s356_s3 }
  0x3c   :  { %p189_p9 = pnand %p187_p8, %p184_p7 }
  0x3e   :  { %192 = shalt.err (!%p189_p9)
}
  0x3f   :  { %96 = dma.vmem_to_hbm [thread:$0]  %s94_s14, 16, %s356_s3, [#allocation9]  }
  0x40   :  { %s193_s30 = scalar_lea.vmem %s301_s16, 16  ;;  %s197_s5 = scalar_lea.vmem %s301_s16, 32 }
  0x41   :  { %p194_p10 = scmp.ne.s32.totalorder %s301_s16, %s193_s30  ;;  %p198_p11 = scmp.lt.s32.totalorder %s301_s16, %s301_s16 }
  0x42   :  { %p199_p12 = scmp.lt.s32.totalorder %s197_s5, %s193_s30 }
  0x44   :  { %p200_p13 = por %p199_p12, %p198_p11 }
  0x46   :  { %p201_p0 = pnand %p200_p13, %p194_p10 }
  0x48   :  { %204 = shalt.err (!%p201_p0)
}
  0x49   :  { %s205_s8 = scalar_lea.hbm %s357_s4, 16 }
  0x4a   :  { %p206_p1 = scmp.ne.s32.totalorder %s357_s4, %s205_s8  ;;  %p209_p2 = scmp.lt.u32.totalorder %s205_s8, %s357_s4 }
  0x4c   :  { %p211_p3 = pnand %p209_p2, %p206_p1 }
  0x4e   :  { %214 = shalt.err (!%p211_p3)
}
  0x4f   :  { %106 = dma.vmem_to_hbm [thread:$0]  %s301_s16, 16, %s357_s4, [#allocation9]   ;;  %74 = vst [vmem:[#allocation7] sm:$0x1] %v56_v26 }
  0x50   :  { %s215_s13 = scalar_lea.vmem %s303_s18, 16  ;;  %s219_s1 = scalar_lea.vmem %s303_s18, 32 }
  0x51   :  { %p216_p4 = scmp.ne.s32.totalorder %s303_s18, %s215_s13  ;;  %p220_p5 = scmp.lt.s32.totalorder %s303_s18, %s303_s18 }
  0x52   :  { %p221_p6 = scmp.lt.s32.totalorder %s219_s1, %s215_s13 }
  0x54   :  { %p222_p7 = por %p221_p6, %p220_p5 }
  0x56   :  { %p223_p8 = pnand %p222_p7, %p216_p4 }
  0x58   :  { %226 = shalt.err (!%p223_p8)
}
  0x59   :  { %s227_s17 = scalar_lea.hbm %s355_s2, 16 }
  0x5a   :  { %p228_p9 = scmp.ne.s32.totalorder %s355_s2, %s227_s17  ;;  %p231_p10 = scmp.lt.u32.totalorder %s227_s17, %s355_s2 }
  0x5c   :  { %p233_p11 = pnand %p231_p10, %p228_p9 }
  0x5e   :  { %236 = shalt.err (!%p233_p11)
}
  0x5f   :  { %86 = dma.vmem_to_hbm [thread:$0]  %s303_s18, 16, %s355_s2, [#allocation4]  }
  0x60   :  { %241 = dma.done.wait [#allocation4], 16  }
  0x61   :  { %242 = vsyncadd [#allocation4], 4294967280 }
  0x62   :  { %243 = dma.done.wait [#allocation9], 32  }
  0x63   :  { %244 = vsyncadd [#allocation9], 4294967264 }
  0x64   :  { %116 = vsyncpa [#allocation3], 1 }
  0x65   :  { %117 = vsyncpa [#allocation6], 1 }
  0x66   :  { %118 = vsyncpa [#allocation4], 1 }
  0x67   :  { %119 = vsyncpa [#allocation9], 1 }

</bundles_post_ra>
